<compile_context>
chip_gen: v6e
topology: v6e:2x2x1
jax: 0.10.0
libtpu: 0.0.40
codegen_flags: <defaults>
</compile_context>

<pallas_src>
import functools

import numpy as np
import jax
import jax.numpy as jnp
from jax import lax
from jax.experimental import pallas as pl
from jax.experimental.pallas import tpu as pltpu


def _fused_unet_block_kernel(x_ref, w1_ref, b1_ref, w2_ref, b2_ref, mask_ref,
                             o_ref, s_ref, *, H, W, Nb, CP, Cin, C_out, slope):
    """conv3x3(pad=1) -> LeakyReLU -> conv3x3(pad=1) -> LeakyReLU for Nb images.

    x_ref   : (Nb, Cin, H*W)    f32   inputs, channels on sublanes, flat spatial on lanes
    w*_ref  : (CP, 9*CP)        bf16  flattened weights (K index = (kh*3+kw)*CP + ci)
    b*_ref  : (CP, 1)           f32
    mask_ref: (9, H*W)          f32   per-tap validity masks (1 inside image, 0 at halo)
    o_ref   : (Nb, C_out, H*W)  f32   lane-dense output block
    s_ref   : (9*CP, Nb*H*W)    bf16  im2col scratch (matmul RHS)
    """
    HW = H * W

    # Hoisted: load the 9 mask rows once; shared by both convs and all Nb images.
    mask_rows = [mask_ref[pl.ds(k, 1), :] for k in range(9)]        # each (1, HW) f32

    def build_im2col(slab_fn, c):
        # slab_fn(b) -> (c, HW) f32 activation of image b.
        for b in range(Nb):
            a_b = slab_fn(b)
            for kh in range(3):
                for kw in range(3):
                    k = kh * 3 + kw
                    s = (kh - 1) * W + (kw - 1)        # flat source offset of this tap
                    # roll + mask == zero-pad + shifted slice: the mask kills every
                    # position where the circular wrap would pull a wrong value.
                    rolled = a_b if s == 0 else pltpu.roll(a_b, shift=(-s) % HW, axis=1)
                    piece = rolled * mask_rows[k]
                    s_ref[k * CP:k * CP + c, b * HW:(b + 1) * HW] = (
                        piece.astype(s_ref.dtype))

    def matmul_bias_lrelu(w_ref_, b_ref_):
        # Single MXU matmul per conv: bf16 (CP, 9*CP) @ bf16 (9*CP, Nb*HW), f32 acc.
        acc = jnp.dot(w_ref_[...], s_ref[...], preferred_element_type=jnp.float32)
        acc = acc + b_ref_[...]                        # (CP, 1) broadcast over lanes
        return jnp.where(acc >= 0.0, acc, slope * acc)  # LeakyReLU

    # ---- conv1 ----
    if Cin < CP:
        # Zero once so the K rows of padded-in channels are exactly zero (avoids
        # stale-VMEM garbage meeting the zero weight columns).
        s_ref[...] = jnp.zeros(s_ref.shape, s_ref.dtype)
    build_im2col(lambda b: x_ref[b], Cin)
    a1 = matmul_bias_lrelu(w1_ref, b1_ref)             # (CP, Nb*HW) f32, stays on-chip

    # ---- conv2 ----
    build_im2col(lambda b: a1[:, b * HW:(b + 1) * HW], CP)
    a2 = matmul_bias_lrelu(w2_ref, b2_ref)             # (CP, Nb*HW) f32

    for b in range(Nb):
        o_ref[b] = a2[:C_out, b * HW:(b + 1) * HW].astype(o_ref.dtype)


def _prep_weight(w_oihw, cp):
    """(Cout, Cin, 3, 3) -> bf16 (cp, 9*cp); K index = (kh*3+kw)*cp + ci, zero-padded."""
    cout, cin = w_oihw.shape[0], w_oihw.shape[1]
    w = jnp.zeros((cp, 3, 3, cp), jnp.float32)
    w = w.at[:cout, :, :, :cin].set(jnp.transpose(w_oihw, (0, 2, 3, 1)))
    return w.reshape(cp, 9 * cp).astype(jnp.bfloat16)


def _prep_bias(b, cp):
    return jnp.zeros((cp, 1), jnp.float32).at[:b.shape[0], 0].set(b)


def _tap_masks(H, W):
    """(9, H*W) f32 validity masks for a 3x3 conv with padding=1 (host-side, free)."""
    m = np.arange(H * W)
    h, w = m // W, m % W
    rows = []
    for kh in range(3):
        for kw in range(3):
            hh, ww = h + kh - 1, w + kw - 1
            rows.append(((hh >= 0) & (hh < H) & (ww >= 0) & (ww < W)).astype(np.float32))
    return jnp.asarray(np.stack(rows, axis=0))


def _pick_batch_tile(N, HW, target_lanes=2048):
    """Images per grid step: widen the lane axis but keep >= 2 grid steps if possible."""
    if HW % 128 != 0:
        return 1
    best = 1
    for nb in range(1, N + 1):
        if N % nb != 0 or nb * HW > target_lanes:
            continue
        if N // nb >= 2 or N == 1:
            best = nb
    return best


def unet_conv_block(x_nchw, params, *, slope=0.2, out_dtype=jnp.float32):
    """UNetConvBlock forward (NCHW in / NCHW out), fused into one pallas_call."""
    N, Cin, H, W = x_nchw.shape
    Cout = params["w1"].shape[0]
    HW = H * W
    CP = ((max(Cin, Cout) + 7) // 8) * 8           # channels padded to sublane tile
    C_OUT = ((Cout + 7) // 8) * 8                  # output rows actually written back
    Nb = _pick_batch_tile(N, HW)
    grid_n = N // Nb

    x_flat = x_nchw.reshape(N, Cin, HW)            # metadata only; stays f32 in HBM
    w1 = _prep_weight(params["w1"], CP)
    w2 = _prep_weight(params["w2"], CP)
    b1 = _prep_bias(params["b1"], CP)
    b2 = _prep_bias(params["b2"], CP)
    masks = _tap_masks(H, W)

    kernel = functools.partial(_fused_unet_block_kernel, H=H, W=W, Nb=Nb, CP=CP,
                               Cin=Cin, C_out=C_OUT, slope=slope)

    out_flat = pl.pallas_call(
        kernel,
        out_shape=jax.ShapeDtypeStruct((N, C_OUT, HW), out_dtype),
        grid_spec=pltpu.PrefetchScalarGridSpec(
            num_scalar_prefetch=0,
            grid=(grid_n,),
            in_specs=[
                pl.BlockSpec((Nb, Cin, HW), lambda n: (n, 0, 0)),   # x (f32)
                pl.BlockSpec((CP, 9 * CP), lambda n: (0, 0)),       # w1 (bf16)
                pl.BlockSpec((CP, 1), lambda n: (0, 0)),            # b1
                pl.BlockSpec((CP, 9 * CP), lambda n: (0, 0)),       # w2 (bf16)
                pl.BlockSpec((CP, 1), lambda n: (0, 0)),            # b2
                pl.BlockSpec((9, HW), lambda n: (0, 0)),            # tap masks
            ],
            out_specs=pl.BlockSpec((Nb, C_OUT, HW), lambda n: (n, 0, 0)),
            scratch_shapes=[
                pltpu.VMEM((9 * CP, Nb * HW), jnp.bfloat16),        # bf16 im2col RHS
            ],
        ),
        compiler_params=pltpu.CompilerParams(
            dimension_semantics=("parallel",),     # v7x: batch splits across 2 TCs
            vmem_limit_bytes=32 * 1024 * 1024,
        ),
    )(x_flat, w1, b1, w2, b2, masks)

    out = out_flat.reshape(N, C_OUT, H, W)
    if C_OUT != Cout:
        out = out[:, :Cout]
    return out


def _reference(x_nchw, params, *, slope=0.2):
    """Pure-JAX f32 reference (lax.conv) matching the PyTorch module."""
    def conv(x, w, b):
        y = lax.conv_general_dilated(
            x, w, window_strides=(1, 1), padding=((1, 1), (1, 1)),
            dimension_numbers=("NCHW", "OIHW", "NCHW"))
        y = y + b[None, :, None, None]
        return jnp.where(y >= 0, y, slope * y)

    x = conv(x_nchw, params["w1"], params["b1"])
    return conv(x, params["w2"], params["b2"])


if __name__ == "__main__":
    in_size, out_size, slope = 4, 8, 0.2
    N, H, W = 2, 16, 16

    key = jax.random.PRNGKey(0)
    k_x, k_w1, k_b1, k_w2, k_b2 = jax.random.split(key, 5)

    x = jax.random.normal(k_x, (N, in_size, H, W), dtype=jnp.float32)
    params = {
        "w1": 0.1 * jax.random.normal(k_w1, (out_size, in_size, 3, 3), jnp.float32),
        "b1": 0.1 * jax.random.normal(k_b1, (out_size,), jnp.float32),
        "w2": 0.1 * jax.random.normal(k_w2, (out_size, out_size, 3, 3), jnp.float32),
        "b2": 0.1 * jax.random.normal(k_b2, (out_size,), jnp.float32),
    }

    out = jax.block_until_ready(unet_conv_block(x, params, slope=slope))
    ref = jax.block_until_ready(_reference(x, params, slope=slope))

    assert out.shape == (N, out_size, H, W), out.shape
    # Weights and im2col activations are bf16 at the MXU (f32 accumulation), so
    # compare against the f32 reference with a bf16-appropriate tolerance.
    max_err = float(jnp.max(jnp.abs(out - ref)))
    assert jnp.allclose(out, ref, atol=3e-2, rtol=3e-2), max_err

    print("KERNEL_OK")
</pallas_src>

<mosaic_0001>
module attributes {stable_mosaic.version = 11 : i64} {
  func.func @_fused_unet_block_kernel(%arg0: i32, %arg1: memref<1x4x256xf32, #tpu.memory_space<vmem>>, %arg2: memref<8x72xbf16, #tpu.memory_space<vmem>>, %arg3: memref<8x1xf32, #tpu.memory_space<vmem>>, %arg4: memref<8x72xbf16, #tpu.memory_space<vmem>>, %arg5: memref<8x1xf32, #tpu.memory_space<vmem>>, %arg6: memref<9x256xf32, #tpu.memory_space<vmem>>, %arg7: memref<1x8x256xf32, #tpu.memory_space<vmem>>, %arg8: memref<72x256xbf16, #tpu.memory_space<vmem>>) attributes {dimension_semantics = [#tpu.dimension_semantics<parallel>], iteration_bounds = array<i64: 2>, scalar_prefetch = 0 : i64, scratch_operands = 1 : i64, tpu.core_type = #tpu.core_type<tc>, window_params = [{transform_indices = @transform_0, window_bounds = array<i64: 1, 4, 256>}, {pipeline_mode = #tpu.pipeline_mode<synchronous>, transform_indices = @transform_1, window_bounds = array<i64: 8, 72>}, {pipeline_mode = #tpu.pipeline_mode<synchronous>, transform_indices = @transform_2, window_bounds = array<i64: 8, 1>}, {pipeline_mode = #tpu.pipeline_mode<synchronous>, transform_indices = @transform_3, window_bounds = array<i64: 8, 72>}, {pipeline_mode = #tpu.pipeline_mode<synchronous>, transform_indices = @transform_4, window_bounds = array<i64: 8, 1>}, {pipeline_mode = #tpu.pipeline_mode<synchronous>, transform_indices = @transform_5, window_bounds = array<i64: 9, 256>}, {transform_indices = @transform_6, window_bounds = array<i64: 1, 8, 256>}]} {
    %c0 = arith.constant 0 : index
    %c0_0 = arith.constant 0 : index
    %0 = vector.load %arg6[%c0, %c0_0] : memref<9x256xf32, #tpu.memory_space<vmem>>, vector<1x256xf32>
    %c1 = arith.constant 1 : index
    %c0_1 = arith.constant 0 : index
    %1 = vector.load %arg6[%c1, %c0_1] : memref<9x256xf32, #tpu.memory_space<vmem>>, vector<1x256xf32>
    %c2 = arith.constant 2 : index
    %c0_2 = arith.constant 0 : index
    %2 = vector.load %arg6[%c2, %c0_2] : memref<9x256xf32, #tpu.memory_space<vmem>>, vector<1x256xf32>
    %c3 = arith.constant 3 : index
    %c0_3 = arith.constant 0 : index
    %3 = vector.load %arg6[%c3, %c0_3] : memref<9x256xf32, #tpu.memory_space<vmem>>, vector<1x256xf32>
    %c4 = arith.constant 4 : index
    %c0_4 = arith.constant 0 : index
    %4 = vector.load %arg6[%c4, %c0_4] : memref<9x256xf32, #tpu.memory_space<vmem>>, vector<1x256xf32>
    %c5 = arith.constant 5 : index
    %c0_5 = arith.constant 0 : index
    %5 = vector.load %arg6[%c5, %c0_5] : memref<9x256xf32, #tpu.memory_space<vmem>>, vector<1x256xf32>
    %c6 = arith.constant 6 : index
    %c0_6 = arith.constant 0 : index
    %6 = vector.load %arg6[%c6, %c0_6] : memref<9x256xf32, #tpu.memory_space<vmem>>, vector<1x256xf32>
    %c7 = arith.constant 7 : index
    %c0_7 = arith.constant 0 : index
    %7 = vector.load %arg6[%c7, %c0_7] : memref<9x256xf32, #tpu.memory_space<vmem>>, vector<1x256xf32>
    %c8 = arith.constant 8 : index
    %c0_8 = arith.constant 0 : index
    %8 = vector.load %arg6[%c8, %c0_8] : memref<9x256xf32, #tpu.memory_space<vmem>>, vector<1x256xf32>
    %cst = arith.constant 0.000000e+00 : bf16
    %9 = vector.broadcast %cst : bf16 to vector<72x256xbf16>
    %c0_9 = arith.constant 0 : index
    %c0_10 = arith.constant 0 : index
    %10 = vector.load %arg8[%c0_9, %c0_10] : memref<72x256xbf16, #tpu.memory_space<vmem>>, vector<72x256xbf16>
    tpu.vector_store %arg8[%c0_9, %c0_10], %9 {strides = array<i32>} : memref<72x256xbf16, #tpu.memory_space<vmem>>, vector<72x256xbf16>,
    %c0_11 = arith.constant 0 : index
    %c0_12 = arith.constant 0 : index
    %c0_13 = arith.constant 0 : index
    %11 = vector.load %arg1[%c0_11, %c0_12, %c0_13] : memref<1x4x256xf32, #tpu.memory_space<vmem>>, vector<1x4x256xf32>
    %12 = vector.shape_cast %11 : vector<1x4x256xf32> to vector<4x256xf32>
    %c17_i32 = arith.constant 17 : i32
    %13 = tpu.dynamic_rotate %12 by %c17_i32 dim 1 : vector<4x256xf32>, i32 -> vector<4x256xf32>
    %14 = vector.broadcast %0 : vector<1x256xf32> to vector<4x256xf32>
    %15 = arith.mulf %13, %14 : vector<4x256xf32>
    %16 = arith.truncf %15 : vector<4x256xf32> to vector<4x256xbf16>
    %c0_14 = arith.constant 0 : index
    %c0_15 = arith.constant 0 : index
    %17 = vector.load %arg8[%c0_14, %c0_15] : memref<72x256xbf16, #tpu.memory_space<vmem>>, vector<4x256xbf16>
    tpu.vector_store %arg8[%c0_14, %c0_15], %16 {strides = array<i32>} : memref<72x256xbf16, #tpu.memory_space<vmem>>, vector<4x256xbf16>,
    %c16_i32 = arith.constant 16 : i32
    %18 = tpu.dynamic_rotate %12 by %c16_i32 dim 1 : vector<4x256xf32>, i32 -> vector<4x256xf32>
    %19 = vector.broadcast %1 : vector<1x256xf32> to vector<4x256xf32>
    %20 = arith.mulf %18, %19 : vector<4x256xf32>
    %21 = arith.truncf %20 : vector<4x256xf32> to vector<4x256xbf16>
    %c8_16 = arith.constant 8 : index
    %c0_17 = arith.constant 0 : index
    %22 = vector.load %arg8[%c8_16, %c0_17] : memref<72x256xbf16, #tpu.memory_space<vmem>>, vector<4x256xbf16>
    tpu.vector_store %arg8[%c8_16, %c0_17], %21 {strides = array<i32>} : memref<72x256xbf16, #tpu.memory_space<vmem>>, vector<4x256xbf16>,
    %c15_i32 = arith.constant 15 : i32
    %23 = tpu.dynamic_rotate %12 by %c15_i32 dim 1 : vector<4x256xf32>, i32 -> vector<4x256xf32>
    %24 = vector.broadcast %2 : vector<1x256xf32> to vector<4x256xf32>
    %25 = arith.mulf %23, %24 : vector<4x256xf32>
    %26 = arith.truncf %25 : vector<4x256xf32> to vector<4x256xbf16>
    %c16 = arith.constant 16 : index
    %c0_18 = arith.constant 0 : index
    %27 = vector.load %arg8[%c16, %c0_18] : memref<72x256xbf16, #tpu.memory_space<vmem>>, vector<4x256xbf16>
    tpu.vector_store %arg8[%c16, %c0_18], %26 {strides = array<i32>} : memref<72x256xbf16, #tpu.memory_space<vmem>>, vector<4x256xbf16>,
    %c1_i32 = arith.constant 1 : i32
    %28 = tpu.dynamic_rotate %12 by %c1_i32 dim 1 : vector<4x256xf32>, i32 -> vector<4x256xf32>
    %29 = vector.broadcast %3 : vector<1x256xf32> to vector<4x256xf32>
    %30 = arith.mulf %28, %29 : vector<4x256xf32>
    %31 = arith.truncf %30 : vector<4x256xf32> to vector<4x256xbf16>
    %c24 = arith.constant 24 : index
    %c0_19 = arith.constant 0 : index
    %32 = vector.load %arg8[%c24, %c0_19] : memref<72x256xbf16, #tpu.memory_space<vmem>>, vector<4x256xbf16>
    tpu.vector_store %arg8[%c24, %c0_19], %31 {strides = array<i32>} : memref<72x256xbf16, #tpu.memory_space<vmem>>, vector<4x256xbf16>,
    %33 = vector.broadcast %4 : vector<1x256xf32> to vector<4x256xf32>
    %34 = arith.mulf %12, %33 : vector<4x256xf32>
    %35 = arith.truncf %34 : vector<4x256xf32> to vector<4x256xbf16>
    %c32 = arith.constant 32 : index
    %c0_20 = arith.constant 0 : index
    %36 = vector.load %arg8[%c32, %c0_20] : memref<72x256xbf16, #tpu.memory_space<vmem>>, vector<4x256xbf16>
    tpu.vector_store %arg8[%c32, %c0_20], %35 {strides = array<i32>} : memref<72x256xbf16, #tpu.memory_space<vmem>>, vector<4x256xbf16>,
    %c255_i32 = arith.constant 255 : i32
    %37 = tpu.dynamic_rotate %12 by %c255_i32 dim 1 : vector<4x256xf32>, i32 -> vector<4x256xf32>
    %38 = vector.broadcast %5 : vector<1x256xf32> to vector<4x256xf32>
    %39 = arith.mulf %37, %38 : vector<4x256xf32>
    %40 = arith.truncf %39 : vector<4x256xf32> to vector<4x256xbf16>
    %c40 = arith.constant 40 : index
    %c0_21 = arith.constant 0 : index
    %41 = vector.load %arg8[%c40, %c0_21] : memref<72x256xbf16, #tpu.memory_space<vmem>>, vector<4x256xbf16>
    tpu.vector_store %arg8[%c40, %c0_21], %40 {strides = array<i32>} : memref<72x256xbf16, #tpu.memory_space<vmem>>, vector<4x256xbf16>,
    %c241_i32 = arith.constant 241 : i32
    %42 = tpu.dynamic_rotate %12 by %c241_i32 dim 1 : vector<4x256xf32>, i32 -> vector<4x256xf32>
    %43 = vector.broadcast %6 : vector<1x256xf32> to vector<4x256xf32>
    %44 = arith.mulf %42, %43 : vector<4x256xf32>
    %45 = arith.truncf %44 : vector<4x256xf32> to vector<4x256xbf16>
    %c48 = arith.constant 48 : index
    %c0_22 = arith.constant 0 : index
    %46 = vector.load %arg8[%c48, %c0_22] : memref<72x256xbf16, #tpu.memory_space<vmem>>, vector<4x256xbf16>
    tpu.vector_store %arg8[%c48, %c0_22], %45 {strides = array<i32>} : memref<72x256xbf16, #tpu.memory_space<vmem>>, vector<4x256xbf16>,
    %c240_i32 = arith.constant 240 : i32
    %47 = tpu.dynamic_rotate %12 by %c240_i32 dim 1 : vector<4x256xf32>, i32 -> vector<4x256xf32>
    %48 = vector.broadcast %7 : vector<1x256xf32> to vector<4x256xf32>
    %49 = arith.mulf %47, %48 : vector<4x256xf32>
    %50 = arith.truncf %49 : vector<4x256xf32> to vector<4x256xbf16>
    %c56 = arith.constant 56 : index
    %c0_23 = arith.constant 0 : index
    %51 = vector.load %arg8[%c56, %c0_23] : memref<72x256xbf16, #tpu.memory_space<vmem>>, vector<4x256xbf16>
    tpu.vector_store %arg8[%c56, %c0_23], %50 {strides = array<i32>} : memref<72x256xbf16, #tpu.memory_space<vmem>>, vector<4x256xbf16>,
    %c239_i32 = arith.constant 239 : i32
    %52 = tpu.dynamic_rotate %12 by %c239_i32 dim 1 : vector<4x256xf32>, i32 -> vector<4x256xf32>
    %53 = vector.broadcast %8 : vector<1x256xf32> to vector<4x256xf32>
    %54 = arith.mulf %52, %53 : vector<4x256xf32>
    %55 = arith.truncf %54 : vector<4x256xf32> to vector<4x256xbf16>
    %c64 = arith.constant 64 : index
    %c0_24 = arith.constant 0 : index
    %56 = vector.load %arg8[%c64, %c0_24] : memref<72x256xbf16, #tpu.memory_space<vmem>>, vector<4x256xbf16>
    tpu.vector_store %arg8[%c64, %c0_24], %55 {strides = array<i32>} : memref<72x256xbf16, #tpu.memory_space<vmem>>, vector<4x256xbf16>,
    %c0_25 = arith.constant 0 : index
    %c0_26 = arith.constant 0 : index
    %57 = vector.load %arg2[%c0_25, %c0_26] : memref<8x72xbf16, #tpu.memory_space<vmem>>, vector<8x72xbf16>
    %c0_27 = arith.constant 0 : index
    %c0_28 = arith.constant 0 : index
    %58 = vector.load %arg8[%c0_27, %c0_28] : memref<72x256xbf16, #tpu.memory_space<vmem>>, vector<72x256xbf16>
    %cst_29 = arith.constant dense<0.000000e+00> : vector<8x256xf32>
    %59 = tpu.matmul %57, %58, %cst_29 {dimension_numbers = #tpu.dot_dimension_numbers<[1], [0], [0], [1], [0, 0, 1, 1], [], []>} : vector<8x72xbf16>, vector<72x256xbf16>, vector<8x256xf32> -> vector<8x256xf32>
    %c0_30 = arith.constant 0 : index
    %c0_31 = arith.constant 0 : index
    %60 = vector.load %arg3[%c0_30, %c0_31] : memref<8x1xf32, #tpu.memory_space<vmem>>, vector<8x1xf32>
    %61 = vector.broadcast %60 : vector<8x1xf32> to vector<8x256xf32>
    %62 = arith.addf %59, %61 : vector<8x256xf32>
    %cst_32 = arith.constant 0.000000e+00 : f32
    %63 = vector.broadcast %cst_32 : f32 to vector<8x256xf32>
    %64 = arith.cmpf oge, %62, %63 : vector<8x256xf32>
    %cst_33 = arith.constant 2.000000e-01 : f32
    %65 = vector.broadcast %cst_33 : f32 to vector<8x256xf32>
    %66 = arith.mulf %65, %62 : vector<8x256xf32>
    %67 = arith.select %64, %62, %66 : vector<8x256xi1>, vector<8x256xf32>
    %c17_i32_34 = arith.constant 17 : i32
    %68 = tpu.dynamic_rotate %67 by %c17_i32_34 dim 1 : vector<8x256xf32>, i32 -> vector<8x256xf32>
    %69 = vector.broadcast %0 : vector<1x256xf32> to vector<8x256xf32>
    %70 = arith.mulf %68, %69 : vector<8x256xf32>
    %71 = arith.truncf %70 : vector<8x256xf32> to vector<8x256xbf16>
    %c0_35 = arith.constant 0 : index
    %c0_36 = arith.constant 0 : index
    %72 = vector.load %arg8[%c0_35, %c0_36] : memref<72x256xbf16, #tpu.memory_space<vmem>>, vector<8x256xbf16>
    tpu.vector_store %arg8[%c0_35, %c0_36], %71 {strides = array<i32>} : memref<72x256xbf16, #tpu.memory_space<vmem>>, vector<8x256xbf16>,
    %c16_i32_37 = arith.constant 16 : i32
    %73 = tpu.dynamic_rotate %67 by %c16_i32_37 dim 1 : vector<8x256xf32>, i32 -> vector<8x256xf32>
    %74 = vector.broadcast %1 : vector<1x256xf32> to vector<8x256xf32>
    %75 = arith.mulf %73, %74 : vector<8x256xf32>
    %76 = arith.truncf %75 : vector<8x256xf32> to vector<8x256xbf16>
    %c8_38 = arith.constant 8 : index
    %c0_39 = arith.constant 0 : index
    %77 = vector.load %arg8[%c8_38, %c0_39] : memref<72x256xbf16, #tpu.memory_space<vmem>>, vector<8x256xbf16>
    tpu.vector_store %arg8[%c8_38, %c0_39], %76 {strides = array<i32>} : memref<72x256xbf16, #tpu.memory_space<vmem>>, vector<8x256xbf16>,
    %c15_i32_40 = arith.constant 15 : i32
    %78 = tpu.dynamic_rotate %67 by %c15_i32_40 dim 1 : vector<8x256xf32>, i32 -> vector<8x256xf32>
    %79 = vector.broadcast %2 : vector<1x256xf32> to vector<8x256xf32>
    %80 = arith.mulf %78, %79 : vector<8x256xf32>
    %81 = arith.truncf %80 : vector<8x256xf32> to vector<8x256xbf16>
    %c16_41 = arith.constant 16 : index
    %c0_42 = arith.constant 0 : index
    %82 = vector.load %arg8[%c16_41, %c0_42] : memref<72x256xbf16, #tpu.memory_space<vmem>>, vector<8x256xbf16>
    tpu.vector_store %arg8[%c16_41, %c0_42], %81 {strides = array<i32>} : memref<72x256xbf16, #tpu.memory_space<vmem>>, vector<8x256xbf16>,
    %c1_i32_43 = arith.constant 1 : i32
    %83 = tpu.dynamic_rotate %67 by %c1_i32_43 dim 1 : vector<8x256xf32>, i32 -> vector<8x256xf32>
    %84 = vector.broadcast %3 : vector<1x256xf32> to vector<8x256xf32>
    %85 = arith.mulf %83, %84 : vector<8x256xf32>
    %86 = arith.truncf %85 : vector<8x256xf32> to vector<8x256xbf16>
    %c24_44 = arith.constant 24 : index
    %c0_45 = arith.constant 0 : index
    %87 = vector.load %arg8[%c24_44, %c0_45] : memref<72x256xbf16, #tpu.memory_space<vmem>>, vector<8x256xbf16>
    tpu.vector_store %arg8[%c24_44, %c0_45], %86 {strides = array<i32>} : memref<72x256xbf16, #tpu.memory_space<vmem>>, vector<8x256xbf16>,
    %88 = vector.broadcast %4 : vector<1x256xf32> to vector<8x256xf32>
    %89 = arith.mulf %67, %88 : vector<8x256xf32>
    %90 = arith.truncf %89 : vector<8x256xf32> to vector<8x256xbf16>
    %c32_46 = arith.constant 32 : index
    %c0_47 = arith.constant 0 : index
    %91 = vector.load %arg8[%c32_46, %c0_47] : memref<72x256xbf16, #tpu.memory_space<vmem>>, vector<8x256xbf16>
    tpu.vector_store %arg8[%c32_46, %c0_47], %90 {strides = array<i32>} : memref<72x256xbf16, #tpu.memory_space<vmem>>, vector<8x256xbf16>,
    %c255_i32_48 = arith.constant 255 : i32
    %92 = tpu.dynamic_rotate %67 by %c255_i32_48 dim 1 : vector<8x256xf32>, i32 -> vector<8x256xf32>
    %93 = vector.broadcast %5 : vector<1x256xf32> to vector<8x256xf32>
    %94 = arith.mulf %92, %93 : vector<8x256xf32>
    %95 = arith.truncf %94 : vector<8x256xf32> to vector<8x256xbf16>
    %c40_49 = arith.constant 40 : index
    %c0_50 = arith.constant 0 : index
    %96 = vector.load %arg8[%c40_49, %c0_50] : memref<72x256xbf16, #tpu.memory_space<vmem>>, vector<8x256xbf16>
    tpu.vector_store %arg8[%c40_49, %c0_50], %95 {strides = array<i32>} : memref<72x256xbf16, #tpu.memory_space<vmem>>, vector<8x256xbf16>,
    %c241_i32_51 = arith.constant 241 : i32
    %97 = tpu.dynamic_rotate %67 by %c241_i32_51 dim 1 : vector<8x256xf32>, i32 -> vector<8x256xf32>
    %98 = vector.broadcast %6 : vector<1x256xf32> to vector<8x256xf32>
    %99 = arith.mulf %97, %98 : vector<8x256xf32>
    %100 = arith.truncf %99 : vector<8x256xf32> to vector<8x256xbf16>
    %c48_52 = arith.constant 48 : index
    %c0_53 = arith.constant 0 : index
    %101 = vector.load %arg8[%c48_52, %c0_53] : memref<72x256xbf16, #tpu.memory_space<vmem>>, vector<8x256xbf16>
    tpu.vector_store %arg8[%c48_52, %c0_53], %100 {strides = array<i32>} : memref<72x256xbf16, #tpu.memory_space<vmem>>, vector<8x256xbf16>,
    %c240_i32_54 = arith.constant 240 : i32
    %102 = tpu.dynamic_rotate %67 by %c240_i32_54 dim 1 : vector<8x256xf32>, i32 -> vector<8x256xf32>
    %103 = vector.broadcast %7 : vector<1x256xf32> to vector<8x256xf32>
    %104 = arith.mulf %102, %103 : vector<8x256xf32>
    %105 = arith.truncf %104 : vector<8x256xf32> to vector<8x256xbf16>
    %c56_55 = arith.constant 56 : index
    %c0_56 = arith.constant 0 : index
    %106 = vector.load %arg8[%c56_55, %c0_56] : memref<72x256xbf16, #tpu.memory_space<vmem>>, vector<8x256xbf16>
    tpu.vector_store %arg8[%c56_55, %c0_56], %105 {strides = array<i32>} : memref<72x256xbf16, #tpu.memory_space<vmem>>, vector<8x256xbf16>,
    %c239_i32_57 = arith.constant 239 : i32
    %107 = tpu.dynamic_rotate %67 by %c239_i32_57 dim 1 : vector<8x256xf32>, i32 -> vector<8x256xf32>
    %108 = vector.broadcast %8 : vector<1x256xf32> to vector<8x256xf32>
    %109 = arith.mulf %107, %108 : vector<8x256xf32>
    %110 = arith.truncf %109 : vector<8x256xf32> to vector<8x256xbf16>
    %c64_58 = arith.constant 64 : index
    %c0_59 = arith.constant 0 : index
    %111 = vector.load %arg8[%c64_58, %c0_59] : memref<72x256xbf16, #tpu.memory_space<vmem>>, vector<8x256xbf16>
    tpu.vector_store %arg8[%c64_58, %c0_59], %110 {strides = array<i32>} : memref<72x256xbf16, #tpu.memory_space<vmem>>, vector<8x256xbf16>,
    %c0_60 = arith.constant 0 : index
    %c0_61 = arith.constant 0 : index
    %112 = vector.load %arg4[%c0_60, %c0_61] : memref<8x72xbf16, #tpu.memory_space<vmem>>, vector<8x72xbf16>
    %c0_62 = arith.constant 0 : index
    %c0_63 = arith.constant 0 : index
    %113 = vector.load %arg8[%c0_62, %c0_63] : memref<72x256xbf16, #tpu.memory_space<vmem>>, vector<72x256xbf16>
    %cst_64 = arith.constant dense<0.000000e+00> : vector<8x256xf32>
    %114 = tpu.matmul %112, %113, %cst_64 {dimension_numbers = #tpu.dot_dimension_numbers<[1], [0], [0], [1], [0, 0, 1, 1], [], []>} : vector<8x72xbf16>, vector<72x256xbf16>, vector<8x256xf32> -> vector<8x256xf32>
    %c0_65 = arith.constant 0 : index
    %c0_66 = arith.constant 0 : index
    %115 = vector.load %arg5[%c0_65, %c0_66] : memref<8x1xf32, #tpu.memory_space<vmem>>, vector<8x1xf32>
    %116 = vector.broadcast %115 : vector<8x1xf32> to vector<8x256xf32>
    %117 = arith.addf %114, %116 : vector<8x256xf32>
    %cst_67 = arith.constant 0.000000e+00 : f32
    %118 = vector.broadcast %cst_67 : f32 to vector<8x256xf32>
    %119 = arith.cmpf oge, %117, %118 : vector<8x256xf32>
    %cst_68 = arith.constant 2.000000e-01 : f32
    %120 = vector.broadcast %cst_68 : f32 to vector<8x256xf32>
    %121 = arith.mulf %120, %117 : vector<8x256xf32>
    %122 = arith.select %119, %117, %121 : vector<8x256xi1>, vector<8x256xf32>
    %c0_69 = arith.constant 0 : index
    %c0_70 = arith.constant 0 : index
    %c0_71 = arith.constant 0 : index
    %123 = vector.load %arg7[%c0_69, %c0_70, %c0_71] : memref<1x8x256xf32, #tpu.memory_space<vmem>>, vector<1x8x256xf32>
    %124 = vector.shape_cast %123 : vector<1x8x256xf32> to vector<8x256xf32>
    %125 = vector.shape_cast %122 : vector<8x256xf32> to vector<1x8x256xf32>
    tpu.vector_store %arg7[%c0_69, %c0_70, %c0_71], %125 {strides = array<i32>} : memref<1x8x256xf32, #tpu.memory_space<vmem>>, vector<1x8x256xf32>,
    return
  }
  func.func @transform_0(%arg0: i32) -> (i32, i32, i32) {
    %c0_i32 = arith.constant 0 : i32
    %c0_i32_0 = arith.constant 0 : i32
    %c0_i32_1 = arith.constant 0 : i32
    return %arg0, %c0_i32, %c0_i32_0 : i32, i32, i32
  }
  func.func @transform_1(%arg0: i32) -> (i32, i32) {
    %c0_i32 = arith.constant 0 : i32
    %c0_i32_0 = arith.constant 0 : i32
    %c0_i32_1 = arith.constant 0 : i32
    return %c0_i32, %c0_i32_0 : i32, i32
  }
  func.func @transform_2(%arg0: i32) -> (i32, i32) {
    %c0_i32 = arith.constant 0 : i32
    %c0_i32_0 = arith.constant 0 : i32
    %c0_i32_1 = arith.constant 0 : i32
    return %c0_i32, %c0_i32_0 : i32, i32
  }
  func.func @transform_3(%arg0: i32) -> (i32, i32) {
    %c0_i32 = arith.constant 0 : i32
    %c0_i32_0 = arith.constant 0 : i32
    %c0_i32_1 = arith.constant 0 : i32
    return %c0_i32, %c0_i32_0 : i32, i32
  }
  func.func @transform_4(%arg0: i32) -> (i32, i32) {
    %c0_i32 = arith.constant 0 : i32
    %c0_i32_0 = arith.constant 0 : i32
    %c0_i32_1 = arith.constant 0 : i32
    return %c0_i32, %c0_i32_0 : i32, i32
  }
  func.func @transform_5(%arg0: i32) -> (i32, i32) {
    %c0_i32 = arith.constant 0 : i32
    %c0_i32_0 = arith.constant 0 : i32
    %c0_i32_1 = arith.constant 0 : i32
    return %c0_i32, %c0_i32_0 : i32, i32
  }
  func.func @transform_6(%arg0: i32) -> (i32, i32, i32) {
    %c0_i32 = arith.constant 0 : i32
    %c0_i32_0 = arith.constant 0 : i32
    %c0_i32_1 = arith.constant 0 : i32
    return %arg0, %c0_i32, %c0_i32_0 : i32, i32, i32
  }
}

</mosaic_0001>

<bundles_post_ra>
// kernel: tpu_custom_call.1
= control target key start
LH: loop header
LB: loop body
LE: loop exit
PB: predicated region body
PF: predicated region fallthrough
CT: control target
= control target key end

     0   :  { %11 = vsyncpa [#allocation4], 0  ;;  %s1755_s0 = inlined_call_operand.vmem [shape: f32[2,4,256], index: 0, kind: input, shape index: {}]   ;;  %s1756_s1 = inlined_call_operand.hbm [shape: bf16[8,72], index: 1, kind: input, shape index: {}]   ;;  %s1757_s2 = inlined_call_operand.vmem [shape: f32[8,1], index: 2, kind: input, shape index: {}]   ;;  %s1758_s3 = inlined_call_operand.vmem [shape: bf16[8,72], index: 3, kind: input, shape index: {}]   ;;  %s1759_s4 = inlined_call_operand.vmem [shape: f32[8,1], index: 4, kind: input, shape index: {}]   ;;  %s1760_s5 = inlined_call_operand.hbm [shape: f32[9,256], index: 5, kind: input, shape index: {}]   ;;  %s1761_s6 = inlined_call_operand.hbm [shape: f32[2,8,256], index: 6, kind: output, shape index: {}]  }
   0x1   :  { %12 = vsyncpa [#allocation7], 0 }
   0x2   :  { %13 = vsyncpa [#allocation5], 0 }
   0x3   :  { %15 = vsyncpa [#allocation5 + $0x1], 0  ;;  %s1396_s21 = smov 0   ;;  %s1398_s22 = smov 0  }
   0x4   :  { %s1400_s23 = smov 0   ;;  %s1402_s24 = smov 0  }
   0x5 LB: > { %s1417_s25 = sadd.s32 4294967295, %s1345_s24   ;;  %s1050_s26 = sadd.s32 4294967294, %s1345_s24   ;;  %s1345_s24 = sphi %s1402_s24, %s1779_s24   ;;  %s1341_s23 = sphi %s1400_s23, %s1778_s23   ;;  %s1337_s22 = sphi %s1398_s22, %s1777_s22   ;;  %s1333_s21 = sphi %s1396_s21, %s1776_s21  }
   0x6   : > { %s1421_s27 = sadd.s32 1, %s1345_s24   ;;  %s159_s28 = sadd.s32 1, %s1341_s23 }
   0x7   : > { %s156_s29 = ssub.s32 %s1345_s24, %s1421_s27  ;;  %p169_p0 = scmp.ne.s32.totalorder %s1341_s23, %s1337_s22 }
   0x8   : > { %p157_p1 = scmp.eq.s32.totalorder %s156_s29, 0  ;;  %p170_p2 = scmp.eq.s32.totalorder %s1417_s25, 1 }
   0x9   : > { %p175_p3 = scmp.ne.s32.totalorder %s1337_s22, %s1333_s21  ;;  %p176_p4 = scmp.eq.s32.totalorder %s1050_s26, 1 }
   0xa   : > { %s1432_s30 = scalar_select %p157_p1, %s1341_s23, %s159_s28  }
   0xb   : > { %p1434_p5 = por %p170_p2, %p169_p0  ;;  %p1438_p6 = por %p176_p4, %p175_p3 }
   0xc   : > { %p1051_p7 = scmp.ge.s32.totalorder %s1345_s24, 1  ;;  %p183_p8 = scmp.lt.s32.totalorder %s1345_s24, 3 }
   0xd   : > { %s1765_s7 = scalar_select %p1434_p5, 1, 0 }
   0xe   : > { %s1766_s8 = scalar_select %p1438_p6, 1, 0 }
   0xf   : > { %p1762_p9 = scmp.eq.s32.totalorder %s1417_s25, 0  ;;  %p1445_p10 = pnand %p1051_p7, %p183_p8 }
  0x10   : > { %s1347_s10 = smov [#allocation3]   ;;  %s1348_s12 = smov [#allocation6]  }
  0x11   : > { %s1767_s9 = scalar_select %p1445_p10, 1, 0 }
  0x12   : > { %s196_s11 = sshll.u32 %s1347_s10, 4  ;;  %p1138_p11 = pneg %p1445_p10  ;;  %s197_s11 = int_to_ptr.vmem [resolvable:$true] %s196_s11 }
  0x13   : > { %s215_s13 = sshll.u32 %s1348_s12, 4  ;;  %s1236_s15 = scalar_lea.vmem %s197_s11, 64  ;;  %s216_s13 = int_to_ptr.vmem [resolvable:$true] %s215_s13 }
  0x14   : > { %p1453_p12 = pnand %p1762_p9, %p1138_p11  ;;  %p1237_p0 = scmp.ne.s32.totalorder %s197_s11, %s1236_s15 }
  0x15   : > { %p1244_p3 = scmp.lt.s32.totalorder %s197_s11, %s197_s11  ;;  %p1245_p4 = scmp.lt.s32.totalorder %s1236_s15, %s1236_s15 }
  0x16   : > { %p1227_p13 = pneg %p1453_p12 }
  0x17   : > { %p1246_p7 = por %p1245_p4, %p1244_p3 }
  0x18   : > { %p1239_p1 = pnand %p1237_p0, %p1227_p13 }
  0x1a   : > { %p1240_p2 = pneg %p1239_p1 }
  0x1c   : > { %p1247_p8 = pnand %p1246_p7, %p1240_p2 }
  0x1e   : > { %1250 = shalt.err (!%p1247_p8)
}
  0x1f   : > { %1141 = dma.hbm_to_vmem [thread:$0]  (!%p1453_p12), %s1756_s1, 64, %s197_s11, [#allocation4]  }
  0x20   : > { %s1262_s18 = scalar_lea.vmem %s216_s13, 512  ;;  %p1270_p0 = scmp.lt.s32.totalorder %s216_s13, %s216_s13 }
  0x21   : > { %p1263_p11 = scmp.ne.s32.totalorder %s216_s13, %s1262_s18  ;;  %p1271_p1 = scmp.lt.s32.totalorder %s1262_s18, %s1262_s18 }
  0x23   : > { %p1265_p9 = pnand %p1263_p11, %p1227_p13  ;;  %p1272_p5 = por %p1271_p1, %p1270_p0 }
  0x25   : > { %p1266_p6 = pneg %p1265_p9 }
  0x27   : > { %p1273_p10 = pnand %p1272_p5, %p1266_p6 }
  0x29   : > { %1276 = shalt.err (!%p1273_p10)
}
  0x2a   : > { %s1349_s19 = smov 256   ;;  %s1350_s20 = smov 16  }
  0x2b   : > { %1144 = dma.hbm_to_vmem [thread:$0]  (!%p1453_p12), %s1760_s5, 512, %s216_s13, [#allocation7], %s1349_s19, %s1349_s19, %s1350_s20  }
  0x2c   : > { %p1769_p2 = scmp.ne.s32.totalorder %s1767_s9, 0 }
  0x2d   : > { %p1770_p3 = scmp.eq.s32.totalorder (!%p1769_p2), %s1417_s25, 0 }
  0x2e   : > { %239 = sbr.rel (%p1769_p2) target bundleno = 789 (0x315), region = 44 }
  0x33   : > { %1320 = dma.done.wait (%p1770_p3), [#allocation4], 64   ;;  %p1771_p9 = pmov %p1770_p3 }
  0x34   : > { %p1772_p5 = pmov %p1770_p3 }
  0x35   : > { %1322 = vsyncadd (%p1771_p9), [#allocation4], 4294967232 }
  0x36   : > { %1324 = dma.done.wait (%p1772_p5), [#allocation7], 512   ;;  %p1773_p6 = pmov %p1770_p3 }
  0x37   : > { %p273_p10 = scmp.lt.s32.totalorder %s1417_s25, 1  ;;  %v313_v0 = vlaneseq  ;;  %v1351_v1 = vmov 0   ;;  %s1352_s13 = smov 113   ;;  %v287_v7 = vld [vmem:[#allocation6 + $0x4] ss:$8 sm:$0x3] }
  0x38   : > { %1326 = vsyncadd (%p1773_p6), [#allocation7], 4294966784  ;;  %302 = vst [vmem:[#allocation2 + $0x40] sm:$0xff] %v1351_v1  ;;  %671 = vmatprep.mubr.bf16.mxu0 %v1351_v1  ;;  %1199 = vset.pattern.permute.xlu0 %v1351_v1  ;;  %s1353_s14 = smov 111   ;;  %s1354_s15 = smov 112   ;;  %v577_v14 = vld [vmem:[%s1757_s2] sm:$0xff] }
  0x39   : > { %296 = vst [vmem:[#allocation2 + $0x30] sm:$0xff] %v1351_v1  ;;  %297 = vst [vmem:[#allocation2] sm:$0xff] %v1351_v1  ;;  %s274_s29 = scalar_select %p273_p10, %s1417_s25, 1  ;;  %937 = vmatprep.mubr.bf16.mxu1 %v1351_v1  ;;  %v320_v2 = vshrl.u32 %v313_v0, 7  ;;  %v1523_v15 = vand.u32 127, %v313_v0  ;;  %vm632_vm7 = vcmask 1043456  }
  0x3a   : > { %298 = vst [vmem:[#allocation2 + $0x18] sm:$0xff] %v1351_v1  ;;  %299 = vst [vmem:[#allocation2 + $0x10] sm:$0xff] %v1351_v1  ;;  %s1355_s16 = smov 127   ;;  %s1356_s17 = smov 15   ;;  %vm628_vm9 = vcmask 588800  }
  0x3b   : > { %300 = vst [vmem:[#allocation2 + $0x20] sm:$0xff] %v1351_v1  ;;  %301 = vst [vmem:[#allocation2 + $0x28] sm:$0xff] %v1351_v1  ;;  %s1108_s9 = sshll.u32 %s274_s29, 3  ;;  %v1494_v5 = vsub.s32 0, %v320_v2  ;;  %v1496_v6 = vsub.s32 1, %v320_v2  ;;  %s1357_s18 = smov 1  }
  0x3c   : > { %303 = vst [vmem:[#allocation2 + $0x38] sm:$0xff] %v1351_v1  ;;  %304 = vst [vmem:[#allocation2 + $0x8] sm:$0xff] %v1351_v1  ;;  %s277_s12 = scalar_lea.vmem %s1755_s0, %s1108_s9  ;;  %s1358_s19 = smov 17   ;;  %v291_v16 = vld [vmem:[#allocation6 + $0x6] ss:$8 sm:$0x3] }
  0x3d   : > { %v305_v3 = vld [vmem:[%s277_s12] sm:$0xff]  ;;  %v1499_v8 = vrot.slane %v287_v7, %v1494_v5  ;;  %v1502_v9 = vrot.slane %v287_v7, %v1496_v6  ;;  %s1359_s20 = smov 16   ;;  %vm484_vm0 = vcmp.lt.s32.totalorder %v1523_v15, 113  ;;  %v1527_v19 = vrot.slane %v291_v16, %v1494_v5  ;;  %v293_v21 = vld [vmem:[#allocation6 + $0x7] ss:$8 sm:$0x3] }
  0x3e   : > { %480 = vrot.lane.b32.xlu1 %v305_v3, %s1352_s13  ;;  %538 = vrot.lane.b32.xlu0 %v305_v3, %s1353_s14  ;;  %v307_v4 = vcombine.high %v305_v3, %v305_v3  ;;  %v1530_v20 = vrot.slane %v291_v16, %v1496_v6  ;;  %v295_v22 = vld [vmem:[#allocation6 + $0x10] ss:$8 sm:$0x3]  ;;  %vm513_vm1 = vcmp.lt.s32.totalorder %v1523_v15, 112  ;;  %vm542_vm2 = vcmp.lt.s32.totalorder %v1523_v15, 111  ;;  %s270_s12 = sand.u32 1, %s1337_s22  }
  0x3f   : > { %v436_v10 = vcombine.low %v1499_v8, %v1502_v9  ;;  %v1539_v27 = vrot.slane %v293_v21, %v1494_v5  ;;  %v1542_v28 = vrot.slane %v293_v21, %v1496_v6  ;;  %v289_v29 = vld [vmem:[#allocation6 + $0x5] ss:$8 sm:$0x3]  ;;  %v1547_v32 = vrot.slane %v295_v22, %v1494_v5  ;;  %v283_v47 = vld [vmem:[#allocation6 + $0x2] ss:$8 sm:$0x3] }
  0x40   : > { %v1550_v33 = vrot.slane %v295_v22, %v1496_v6  ;;  %vm455_vm3 = vcmp.lt.s32.totalorder %v1523_v15, 127  ;;  %v1554_v37 = vrot.slane %v289_v29, %v1494_v5  ;;  %v1557_v38 = vrot.slane %v289_v29, %v1496_v6  ;;  %v285_v58 = vld [vmem:[#allocation6 + $0x3] ss:$8 sm:$0x3]  ;;  %p1774_p13 = scmp.ne.s32.totalorder %s1765_s7, 0 }
  0x41   : > { %v438_v11 = vmul.f32 %v436_v10, %v305_v3  ;;  %vm373_vm4 = vcmp.lt.s32.totalorder %v1523_v15, 15  ;;  %v1579_v56 = vrot.slane %v283_v47, %v1494_v5  ;;  %v1582_v57 = vrot.slane %v283_v47, %v1496_v6 }
  0x42   : > { %509 = vrot.lane.b32.xlu0 %v305_v3, %s1354_s15  ;;  %482 = vrot.lane.b32.xlu1 %v307_v4, %s1352_s13  ;;  %vm402_vm5 = vcmp.lt.s32.totalorder %v1523_v15, 1  ;;  %v1592_v2 = vrot.slane %v285_v58, %v1494_v5  ;;  %vm315_vm6 = vcmp.lt.s32.totalorder %v1523_v15, 17  ;;  %vm344_vm8 = vcmp.lt.s32.totalorder %v1523_v15, 16 }
  0x43   : > { %v440_v12 = vcombine.high %v438_v11, %v438_v11 }
  0x45   : > { %v1113_v13 = vpack.c.bf16 %v440_v12, %v438_v11 }
  0x46   : > { %511 = vrot.lane.b32.xlu1 %v307_v4, %s1354_s15  ;;  %540 = vrot.lane.b32.xlu0 %v307_v4, %s1353_s14 }
  0x47   : > { %450 = vst [vmem:[#allocation2 + $0x20] sm:$0x33] %v1113_v13 }
  0x4a   : > { %453 = vrot.lane.b32.xlu1 %v307_v4, %s1355_s16  ;;  %451 = vrot.lane.b32.xlu0 %v305_v3, %s1355_s16 }
  0x4e   : > { %371 = vrot.lane.b32.xlu1 %v307_v4, %s1356_s17  ;;  %369 = vrot.lane.b32.xlu0 %v305_v3, %s1356_s17 }
  0x52   : > { %400 = vrot.lane.b32.xlu1 %v307_v4, %s1357_s18  ;;  %398 = vrot.lane.b32.xlu0 %v305_v3, %s1357_s18 }
  0x56   : > { %311 = vrot.lane.b32.xlu1 %v307_v4, %s1358_s19  ;;  %309 = vrot.lane.b32.xlu0 %v305_v3, %s1358_s19 }
  0x5a   : > { %342 = vrot.lane.b32.xlu1 %v307_v4, %s1359_s20  ;;  %340 = vrot.lane.b32.xlu0 %v305_v3, %s1359_s20  ;;  %v1595_v3 = vrot.slane %v285_v58, %v1496_v6  ;;  %v279_v4 = vld [vmem:[#allocation6] ss:$8 sm:$0x3] }
  0x5b   : > { %v1606_v16 = vrot.slane %v279_v4, %v1496_v6 }
  0x5e   : > { %580 = vperm.xlu0 %1199, %v577_v14   ;;  %v1603_v14 = vrot.slane %v279_v4, %v1494_v5 }
  0xb0   : > { %v481_v17 = vpop.permute.xlu1 %480  ;;  %v539_v18 = vpop.permute.xlu0 %538 }
  0xb4   : > { %v510_v23 = vpop.permute.xlu0 %509  ;;  %v483_v24 = vpop.permute.xlu1 %482 }
  0xb5   : > { %v485_v25 = vsel %vm484_vm0, %v481_v17, %v483_v24  ;;  %v486_v26 = vsel %vm484_vm0, %v483_v24, %v481_v17  ;;  %v281_v24 = vld [vmem:[#allocation6 + $0x1] ss:$8 sm:$0x3] }
  0xb6   : > { %v498_v30 = vmul.f32 %v1527_v19, %v485_v25  ;;  %v499_v31 = vmul.f32 %v1530_v20, %v486_v26 }
  0xb8   : > { %v1115_v34 = vpack.c.bf16 %v499_v31, %v498_v30  ;;  %v512_v35 = vpop.permute.xlu1 %511  ;;  %v541_v36 = vpop.permute.xlu0 %540 }
  0xb9   : > { %v514_v39 = vsel %vm513_vm1, %v510_v23, %v512_v35  ;;  %v515_v40 = vsel %vm513_vm1, %v512_v35, %v510_v23  ;;  %v543_v41 = vsel %vm542_vm2, %v539_v18, %v541_v36  ;;  %v544_v42 = vsel %vm542_vm2, %v541_v36, %v539_v18 }
  0xba   : > { %508 = vst [vmem:[#allocation2 + $0x40] sm:$0x33] %v1115_v34  ;;  %v527_v43 = vmul.f32 %v1539_v27, %v514_v39  ;;  %v528_v44 = vmul.f32 %v1542_v28, %v515_v40  ;;  %v556_v45 = vmul.f32 %v1547_v32, %v543_v41  ;;  %v557_v46 = vmul.f32 %v1550_v33, %v544_v42 }
  0xbb   : > { %v1620_v40 = vrot.slane %v281_v24, %v1494_v5  ;;  %v1623_v41 = vrot.slane %v281_v24, %v1496_v6 }
  0xbc   : > { %v1116_v48 = vpack.c.bf16 %v528_v44, %v527_v43  ;;  %v1117_v49 = vpack.c.bf16 %v557_v46, %v556_v45  ;;  %v454_v50 = vpop.permute.xlu1 %453  ;;  %v452_v51 = vpop.permute.xlu0 %451 }
  0xbd   : > { %v456_v52 = vsel %vm455_vm3, %v452_v51, %v454_v50  ;;  %v457_v53 = vsel %vm455_vm3, %v454_v50, %v452_v51 }
  0xbe   : > { %537 = vst [vmem:[#allocation2 + $0x38] sm:$0x33] %v1116_v48  ;;  %566 = vst [vmem:[#allocation2 + $0x8] sm:$0x33] %v1117_v49  ;;  %v469_v54 = vmul.f32 %v1554_v37, %v456_v52  ;;  %v470_v55 = vmul.f32 %v1557_v38, %v457_v53 }
  0xc0   : > { %v1114_v59 = vpack.c.bf16 %v470_v55, %v469_v54  ;;  %v372_v60 = vpop.permute.xlu1 %371  ;;  %v370_v61 = vpop.permute.xlu0 %369  ;;  %v567_v55 = vld [vmem:[#allocation3] sm:$0xf] }
  0xc1   : > { %v374_v62 = vsel %vm373_vm4, %v370_v61, %v372_v60  ;;  %v375_v63 = vsel %vm373_vm4, %v372_v60, %v370_v61 }
  0xc2   : > { %479 = vst [vmem:[#allocation2 + $0x28] sm:$0x33] %v1114_v59  ;;  %v387_v0 = vmul.f32 %v1579_v56, %v375_v63  ;;  %v388_v1 = vmul.f32 %v1582_v57, %v374_v62 }
  0xc4   : > { %v1111_v7 = vpack.c.bf16 %v388_v1, %v387_v0  ;;  %v401_v10 = vpop.permute.xlu1 %400  ;;  %v399_v11 = vpop.permute.xlu0 %398 }
  0xc5   : > { %v403_v12 = vsel %vm402_vm5, %v399_v11, %v401_v10  ;;  %v404_v13 = vsel %vm402_vm5, %v401_v10, %v399_v11  ;;  %v576_v17 = vld [vmem:[#allocation2 + $0x8] sm:$0xff]  ;;  %v1203_v31 = vld [vmem:[#allocation2 + $0x44] ss:$-8 sps:$4 sm:$0xff]   ;;  %v1205_v42 = vld [vmem:[#allocation2 + $0x40] ss:$-8 sps:$4 sm:$0xff]  }
  0xc6   : > { %397 = vst [vmem:[#allocation2 + $0x18] sm:$0x33] %v1111_v7  ;;  %v416_v18 = vmul.f32 %v1592_v2, %v404_v13  ;;  %v417_v21 = vmul.f32 %v1595_v3, %v403_v12  ;;  %v1079_v22 = vcombine.high %v576_v17, %v576_v17  ;;  %v1078_v23 = vcombine.low %v576_v17, %v576_v17 }
  0xc8   : > { %v1112_v25 = vpack.c.bf16 %v417_v21, %v416_v18  ;;  %v312_v26 = vpop.permute.xlu1 %311  ;;  %v310_v29 = vpop.permute.xlu0 %309  ;;  %1080 = vmatprep.subr.msk.bf16.mxu0 %vm632_vm7, %v1079_v22  ;;  %v634_v30 = vsel %vm632_vm7, %v1078_v23, 0 }
  0xc9   : > { %v316_v34 = vsel %vm315_vm6, %v310_v29, %v312_v26  ;;  %v317_v35 = vsel %vm315_vm6, %v312_v26, %v310_v29  ;;  %646 = vmatpush1.bf16.msra.mxu0 %v634_v30  ;;  %v1206_v46 = vld [vmem:[#allocation2 + $0x24] ss:$8 sps:$4 sm:$0xff]   ;;  %v1208_v6 = vld [vmem:[#allocation2 + $0x20] ss:$8 sps:$4 sm:$0xff]  }
  0xca   : > { %426 = vst [vmem:[#allocation2 + $0x10] sm:$0x33] %v1112_v25  ;;  %v329_v36 = vmul.f32 %v1603_v14, %v317_v35  ;;  %v330_v39 = vmul.f32 %v1606_v16, %v316_v34  ;;  %647 = vmatprep.subr.bf16.mxu0 %v1203_v31 }
  0xcc   : > { %v1109_v43 = vpack.c.bf16 %v330_v39, %v329_v36  ;;  %v343_v44 = vpop.permute.xlu1 %342  ;;  %v341_v45 = vpop.permute.xlu0 %340 }
  0xcd   : > { %v345_v47 = vsel %vm344_vm8, %v341_v45, %v343_v44  ;;  %v346_v48 = vsel %vm344_vm8, %v343_v44, %v341_v45  ;;  %648 = vmatpush1.bf16.msra.mxu0 %v1205_v42 }
  0xce   : > { %339 = vst [vmem:[#allocation2 + $0x30] sm:$0x33] %v1109_v43  ;;  %v358_v49 = vmul.f32 %v1620_v40, %v346_v48  ;;  %v359_v5 = vmul.f32 %v1623_v41, %v345_v47  ;;  %649 = vmatprep.subr.bf16.mxu0 %v1206_v46 }
  0xd0   : > { %v1110_v50 = vpack.c.bf16 %v359_v5, %v358_v49 }
  0xd1   : > { %650 = vmatpush1.bf16.msra.mxu0 %v1208_v6  ;;  %v1209_v51 = vld [vmem:[#allocation2 + $0x1c] ss:$-8 sps:$4 sm:$0xff]   ;;  %v1211_v52 = vld [vmem:[#allocation2 + $0x18] ss:$-8 sps:$4 sm:$0xff]  }
  0xd2   : > { %368 = vst [vmem:[#allocation2] sm:$0x33] %v1110_v50  ;;  %651 = vmatprep.subr.bf16.mxu0 %v1209_v51 }
  0xd5   : > { %652 = vmatpush1.bf16.msra.mxu0 %v1211_v52 }
  0xd9   : > { %v1212_v53 = vld [vmem:[#allocation2 + $0x34] ss:$-48 sps:$4 sm:$0xff]   ;;  %v1214_v54 = vld [vmem:[#allocation2 + $0x30] ss:$-48 sps:$4 sm:$0xff]   ;;  %v581_v58 = vpop.permute.xlu0 %580 }
  0xda   : > { %653 = vmatprep.subr.bf16.mxu0 %v1212_v53 }
  0xdb   : > { %654 = vmatpush1.bf16.msra.mxu0 %v1214_v54 }
  0xde   : > { %1081 = vmatmul.mubr.msk.bf16.vlgmr.msra.gmra.mxu0 %vm628_vm9, %v567_v55 }
 0x19e   : > { %v673_v59 = vpop.f32.mrf.mxu0 }
 0x19f   : > { %v674_v60 = vadd.f32 %v673_v59, %v581_v58 }
 0x1a0   : > { %v675_v61 = vpop.f32.mrf.mxu0 }
 0x1a1   : > { %vm680_vm10 = vcmp.ge.f32.partialorder %v674_v60, 0.0  ;;  %v682_v62 = vmul.f32 0.2, %v674_v60  ;;  %v676_v63 = vadd.f32 %v675_v61, %v581_v58 }
 0x1a2   : > { %v677_v0 = vpop.f32.mrf.mxu0 }
 0x1a3   : > { %v684_v1 = vsel %vm680_vm10, %v674_v60, %v682_v62  ;;  %vm681_vm11 = vcmp.ge.f32.partialorder %v676_v63, 0.0  ;;  %v683_v4 = vmul.f32 0.2, %v676_v63 }
 0x1a4   : > { %v678_v7 = vpop.f32.mrf.mxu0  ;;  %784 = vrot.lane.b32.xlu0 %v684_v1, %s1352_s13  ;;  %818 = vrot.lane.b32.xlu1 %v684_v1, %s1353_s14  ;;  %v1635_v11 = vmul.f32 %v684_v1, %v1499_v8  ;;  %v845_v8 = vld [vmem:[%s1759_s4] sm:$0xff] }
 0x1a5   : > { %v685_v10 = vsel %vm681_vm11, %v676_v63, %v683_v4 }
 0x1a6   : > { %v1638_v12 = vmul.f32 %v685_v10, %v1502_v9 }
 0x1a8   : > { %v1122_v13 = vpack.c.bf16 %v1638_v12, %v1635_v11  ;;  %801 = vrot.lane.b32.xlu0 %v684_v1, %s1354_s15  ;;  %820 = vrot.lane.b32.xlu1 %v685_v10, %s1353_s14  ;;  %s1127_s14 = sshll.u32 %s1417_s25, 8  ;;  %s1360_s25 = smov [#allocation8]  }
 0x1a9   : > { %s1281_s28 = sshll.u32 %s1360_s25, 4  ;;  %s1282_s28 = int_to_ptr.vmem [resolvable:$false] %s1281_s28 }
 0x1aa   : > { %766 = vst [vmem:[#allocation2 + $0x20] sm:$0xff] %v1122_v13  ;;  %s1283_s29 = scalar_lea.vmem %s1282_s28, 512 }
 0x1ac   : > { %767 = vrot.lane.b32.xlu0 %v684_v1, %s1355_s16  ;;  %786 = vrot.lane.b32.xlu1 %v685_v10, %s1352_s13  ;;  %s1058_s13 = sshll.u32 %s270_s12, 4 }
 0x1b0   : > { %720 = vrot.lane.b32.xlu0 %v684_v1, %s1356_s17  ;;  %803 = vrot.lane.b32.xlu1 %v685_v10, %s1354_s15  ;;  %s272_s15 = scalar_lea.vmem [#allocation8], %s1058_s13 }
 0x1b4   : > { %737 = vrot.lane.b32.xlu0 %v684_v1, %s1357_s18  ;;  %769 = vrot.lane.b32.xlu1 %v685_v10, %s1355_s16  ;;  %s969_s16 = sshll.u32 %s272_s15, 4  ;;  %s970_s16 = int_to_ptr.vmem [resolvable:$true] %s969_s16 }
 0x1b5   : > { %s1277_s26 = scalar_lea.vmem %s970_s16, 256  ;;  %p1284_p8 = scmp.lt.s32.totalorder %s970_s16, %s1282_s28 }
 0x1b6   : > { %p1278_p12 = scmp.ne.s32.totalorder %s970_s16, %s1277_s26  ;;  %p1285_p11 = scmp.lt.s32.totalorder %s1283_s29, %s1277_s26 }
 0x1b8   : > { %686 = vrot.lane.b32.xlu0 %v684_v1, %s1358_s19  ;;  %722 = vrot.lane.b32.xlu1 %v685_v10, %s1356_s17  ;;  %p1279_p4 = pnand %p1278_p12, %p1774_p13  ;;  %p1286_p0 = por %p1285_p11, %p1284_p8 }
 0x1ba   : > { %p1280_p7 = pneg %p1279_p4 }
 0x1bc   : > { %703 = vrot.lane.b32.xlu0 %v684_v1, %s1359_s20  ;;  %739 = vrot.lane.b32.xlu1 %v685_v10, %s1357_s18  ;;  %p1287_p1 = pnand %p1286_p0, %p1280_p7 }
 0x1c0   : > { %848 = vperm.xlu0 %1199, %v845_v8   ;;  %688 = vrot.lane.b32.xlu1 %v685_v10, %s1358_s19  ;;  %s1720_s19 = scalar_lea.hbm %s1761_s6, %s1127_s14 }
 0x1c4   : > { %705 = vrot.lane.b32.xlu1 %v685_v10, %s1359_s20  ;;  %s955_s20 = scalar_lea.sflag [#allocation5], %s270_s12 }
 0x216   : > { %v785_v9 = vpop.permute.xlu0 %784  ;;  %v819_v17 = vpop.permute.xlu1 %818 }
 0x21a   : > { %v802_v18 = vpop.permute.xlu0 %801  ;;  %v821_v21 = vpop.permute.xlu1 %820 }
 0x21b   : > { %v822_v22 = vsel %vm542_vm2, %v819_v17, %v821_v21  ;;  %v823_v23 = vsel %vm542_vm2, %v821_v21, %v819_v17 }
 0x21c   : > { %v824_v24 = vmul.f32 %v822_v22, %v1547_v32  ;;  %v825_v25 = vmul.f32 %v823_v23, %v1550_v33 }
 0x21e   : > { %v1126_v26 = vpack.c.bf16 %v825_v25, %v824_v24  ;;  %v768_v29 = vpop.permute.xlu0 %767  ;;  %v787_v30 = vpop.permute.xlu1 %786  ;;  %v1215_v39 = vpack.c.bf16 %v825_v25, %v825_v25  ;;  %v1216_v42 = vpack.c.bf16 %v824_v24, %v824_v24  ;;  %v835_v24 = vld [vmem:[%s1758_s3] sm:$0xf] }
 0x21f   : > { %v788_v31 = vsel %vm484_vm0, %v785_v9, %v787_v30  ;;  %v789_v34 = vsel %vm484_vm0, %v787_v30, %v785_v9 }
 0x220   : > { %834 = vst [vmem:[#allocation2 + $0x8] sm:$0xff] %v1126_v26  ;;  %v790_v35 = vmul.f32 %v788_v31, %v1527_v19  ;;  %v791_v36 = vmul.f32 %v789_v34, %v1530_v20  ;;  %1101 = vmatprep.subr.msk.bf16.mxu1 %vm632_vm7, %v1215_v39  ;;  %v900_v33 = vsel %vm632_vm7, %v1216_v42, 0 }
 0x221   : > { %912 = vmatpush1.bf16.msra.mxu1 %v900_v33 }
 0x222   : > { %v1124_v43 = vpack.c.bf16 %v791_v36, %v790_v35  ;;  %v804_v32 = vpop.permute.xlu1 %803  ;;  %v721_v46 = vpop.permute.xlu0 %720 }
 0x223   : > { %v805_v44 = vsel %vm513_vm1, %v802_v18, %v804_v32  ;;  %v806_v45 = vsel %vm513_vm1, %v804_v32, %v802_v18 }
 0x224   : > { %800 = vst [vmem:[#allocation2 + $0x40] sm:$0xff] %v1124_v43  ;;  %v807_v19 = vmul.f32 %v805_v44, %v1539_v27  ;;  %v808_v20 = vmul.f32 %v806_v45, %v1542_v28 }
 0x226   : > { %v1125_v47 = vpack.c.bf16 %v808_v20, %v807_v19  ;;  %v770_v48 = vpop.permute.xlu1 %769  ;;  %v1217_v51 = vpack.c.bf16 %v808_v20, %v791_v36  ;;  %v1218_v52 = vpack.c.bf16 %v807_v19, %v790_v35  ;;  %v738_v53 = vpop.permute.xlu0 %737 }
 0x227   : > { %v771_v49 = vsel %vm455_vm3, %v768_v29, %v770_v48  ;;  %v772_v5 = vsel %vm455_vm3, %v770_v48, %v768_v29 }
 0x228   : > { %817 = vst [vmem:[#allocation2 + $0x38] sm:$0xff] %v1125_v47  ;;  %v773_v6 = vmul.f32 %v771_v49, %v1554_v37  ;;  %v774_v50 = vmul.f32 %v772_v5, %v1557_v38  ;;  %913 = vmatprep.subr.bf16.mxu1 %v1217_v51 }
 0x229   : > { %914 = vmatpush1.bf16.msra.mxu1 %v1218_v52 }
 0x22a   : > { %v1123_v54 = vpack.c.bf16 %v774_v50, %v773_v6  ;;  %v723_v27 = vpop.permute.xlu1 %722  ;;  %v1219_v38 = vpack.c.bf16 %v774_v50, %v1638_v12  ;;  %v1220_v59 = vpack.c.bf16 %v773_v6, %v1635_v11  ;;  %v687_v0 = vpop.permute.xlu0 %686 }
 0x22b   : > { %v724_v28 = vsel %vm373_vm4, %v721_v46, %v723_v27  ;;  %v725_v55 = vsel %vm373_vm4, %v723_v27, %v721_v46 }
 0x22c   : > { %783 = vst [vmem:[#allocation2 + $0x28] sm:$0xff] %v1123_v54  ;;  %v726_v58 = vmul.f32 %v725_v55, %v1579_v56  ;;  %v727_v37 = vmul.f32 %v724_v28, %v1582_v57  ;;  %915 = vmatprep.subr.bf16.mxu1 %v1219_v38 }
 0x22d   : > { %916 = vmatpush1.bf16.msra.mxu1 %v1220_v59 }
 0x22e   : > { %v1120_v60 = vpack.c.bf16 %v727_v37, %v726_v58  ;;  %v740_v61 = vpop.permute.xlu1 %739  ;;  %v704_v9 = vpop.permute.xlu0 %703 }
 0x22f   : > { %v741_v62 = vsel %vm402_vm5, %v738_v53, %v740_v61  ;;  %v742_v63 = vsel %vm402_vm5, %v740_v61, %v738_v53 }
 0x230   : > { %736 = vst [vmem:[#allocation2 + $0x18] sm:$0xff] %v1120_v60  ;;  %v743_v56 = vmul.f32 %v742_v63, %v1592_v2  ;;  %v744_v57 = vmul.f32 %v741_v62, %v1595_v3 }
 0x232   : > { %v1121_v1 = vpack.c.bf16 %v744_v57, %v743_v56  ;;  %v689_v4 = vpop.permute.xlu1 %688  ;;  %v1221_v13 = vpack.c.bf16 %v744_v57, %v727_v37  ;;  %v1222_v8 = vpack.c.bf16 %v743_v56, %v726_v58 }
 0x233   : > { %v690_v7 = vsel %vm315_vm6, %v687_v0, %v689_v4  ;;  %v691_v10 = vsel %vm315_vm6, %v689_v4, %v687_v0 }
 0x234   : > { %753 = vst [vmem:[#allocation2 + $0x10] sm:$0xff] %v1121_v1  ;;  %v692_v11 = vmul.f32 %v691_v10, %v1603_v14  ;;  %v693_v12 = vmul.f32 %v690_v7, %v1606_v16  ;;  %917 = vmatprep.subr.bf16.mxu1 %v1221_v13 }
 0x235   : > { %918 = vmatpush1.bf16.msra.mxu1 %v1222_v8 }
 0x236   : > { %v1118_v17 = vpack.c.bf16 %v693_v12, %v692_v11  ;;  %v706_v2 = vpop.permute.xlu1 %705 }
 0x237   : > { %v707_v3 = vsel %vm344_vm8, %v704_v9, %v706_v2  ;;  %v708_v18 = vsel %vm344_vm8, %v706_v2, %v704_v9 }
 0x238   : > { %702 = vst [vmem:[#allocation2 + $0x30] sm:$0xff] %v1118_v17  ;;  %v709_v21 = vmul.f32 %v708_v18, %v1620_v40  ;;  %v710_v14 = vmul.f32 %v707_v3, %v1623_v41 }
 0x23a   : > { %v1119_v16 = vpack.c.bf16 %v710_v14, %v709_v21  ;;  %v1223_v22 = vpack.c.bf16 %v710_v14, %v693_v12  ;;  %v1224_v23 = vpack.c.bf16 %v709_v21, %v692_v11 }
 0x23b   : > { %v849_v15 = vpop.permute.xlu0 %848 }
 0x23c   : > { %719 = vst [vmem:[#allocation2] sm:$0xff] %v1119_v16  ;;  %919 = vmatprep.subr.bf16.mxu1 %v1223_v22 }
 0x23d   : > { %920 = vmatpush1.bf16.msra.mxu1 %v1224_v23 }
 0x240   : > { %1102 = vmatmul.mubr.msk.bf16.vlgmr.msra.gmra.mxu1 %vm628_vm9, %v835_v24 }
 0x300   : > { %v939_v25 = vpop.f32.mrf.mxu1 }
 0x301   : > { %v940_v40 = vadd.f32 %v939_v25, %v849_v15 }
 0x302   : > { %v941_v26 = vpop.f32.mrf.mxu1 }
 0x303   : > { %vm946_vm12 = vcmp.ge.f32.partialorder %v940_v40, 0.0  ;;  %v948_v41 = vmul.f32 0.2, %v940_v40  ;;  %v942_v29 = vadd.f32 %v941_v26, %v849_v15 }
 0x304   : > { %v943_v30 = vpop.f32.mrf.mxu1 }
 0x305   : > { %v950_v31 = vsel %vm946_vm12, %v940_v40, %v948_v41  ;;  %vm947_vm13 = vcmp.ge.f32.partialorder %v942_v29, 0.0  ;;  %v949_v34 = vmul.f32 0.2, %v942_v29 }
 0x306   : > { %952 = vst [vmem:[%s272_s15] sm:$0xff] %v950_v31  ;;  %v944_v35 = vpop.f32.mrf.mxu1 }
 0x307   : > { %v951_v36 = vsel %vm947_vm13, %v942_v29, %v949_v34 }
 0x308   : > { %953 = vst [vmem:[%s272_s15 + $0x8] sm:$0xff] %v951_v36 }
 0x309   : > { %1290 = shalt.err (!%p1287_p1)
}
 0x30a   : > { %s1291_s9 = scalar_lea.hbm %s1720_s19, 256  ;;  %s1295_s12 = scalar_lea.hbm %s1761_s6, 512 }
 0x30b   : > { %p1292_p2 = scmp.ne.s32.totalorder %s1720_s19, %s1291_s9  ;;  %p1296_p5 = scmp.lt.s32.totalorder %s1720_s19, %s1761_s6 }
 0x30c   : > { %p1297_p6 = scmp.lt.s32.totalorder %s1295_s12, %s1291_s9 }
 0x30d   : > { %p1293_p3 = pnand %p1292_p2, %p1774_p13 }
 0x30e   : > { %p1298_p10 = por %p1297_p6, %p1296_p5 }
 0x30f   : > { %p1294_p9 = pneg %p1293_p3 }
 0x311   : > { %p1299_p12 = pnand %p1298_p10, %p1294_p9 }
 0x313   : > { %1302 = shalt.err (!%p1299_p12)
}
 0x314   : > { %1136 = dma.vmem_to_hbm [thread:$0]  (%p1774_p13), %s970_s16, 256, %s1720_s19, %s955_s20  }
 0x315 PF: > { %p1153_p4 = scmp.ge.s32.totalorder %s1345_s24, 2  ;;  %s981_s15 = sand.u32 1, %s1333_s21  }
 0x316   : > { %p1775_p7 = scmp.ne.s32.totalorder %s1766_s8, 0  ;;  %s982_s17 = scalar_lea.sflag [#allocation5], %s981_s15 }
 0x318   : > { %p1146_p8 = pnand %p1153_p4, %p1775_p7 }
 0x31a   : > { %p1147_p11 = pneg %p1146_p8 }
 0x31c   : > { %1328 = dma.done.wait (%p1147_p11), %s982_s17, 256  }
 0x31d   : > { %1330 = vsyncadd (%p1147_p11), %s982_s17, 4294967040  ;;  %p18_p0 = scmp.ge.s32.totalorder %s1421_s27, 4   ;;  %s1776_s21 = smov %s1337_s22 }
 0x31e   : > { %s1777_s22 = smov %s1341_s23  ;;  %s1778_s23 = smov %s1432_s30 }
 0x31f   : > { %s1779_s24 = smov %s1421_s27  ;;  %20 = sbr.rel (!%p18_p0) target bundleno = 5 (0x5), region = 96 }
 0x324   :  { %987 = vsyncpa [#allocation4], 1 }
 0x325   :  { %989 = vsyncpa [#allocation4 + $0x1], 1 }
 0x326   :  { %990 = vsyncpa [#allocation7], 1 }
 0x327   :  { %991 = vsyncpa [#allocation5], 1 }
 0x328   :  { %993 = vsyncpa [#allocation5 + $0x1], 1 }

</bundles_post_ra>
